<compile_context>
chip_gen: v7x
topology: tpu7x:2x2x1
jax: 0.10.0
libtpu: 0.0.40
codegen_flags: <defaults>
</compile_context>

<pallas_src>
import functools

import jax
import jax.numpy as jnp
from jax.experimental import pallas as pl
from jax.experimental.pallas import tpu as pltpu


def _vmem_budget():
    """Generation-aware VMEM sizing.

    ~45% of physical VMEM for explicit tile buffers, ~75% as the Mosaic scoped
    VMEM limit (v7x has only 64 MiB per TC vs 128 MiB on v5e/v6e).
    """
    try:
        cap = int(pltpu.get_tpu_info().vmem_capacity_bytes)
    except Exception:
        cap = 64 * 1024 * 1024  # conservative (v7x-sized) fallback
    return int(cap * 0.45), int(cap * 0.75)


def _pick_thw(hw, cin, cout, x_bytes, out_bytes, budget, max_thw=8192):
    """Largest HW tile whose pass-2 working set fits `budget`.

    Accounts for: double-buffered x and out tiles, the f32 y/z intermediate,
    the (not re-DMA'd but still double-buffered) weight, and scale/shift.
    Prefers t_hw == HW (a full-dim block is always legal, even if not a
    multiple of 128) so no host-side padding / output slicing is ever needed.
    """
    per_col = 2 * cin * x_bytes + 2 * cout * out_bytes + cout * 4
    fixed = 2 * cout * cin * 4 + 4 * cout * 4
    avail = max(budget - fixed, 128 * per_col)
    cap = max((avail // per_col) // 128 * 128, 128)
    if hw <= cap:
        return hw
    return min(cap, max_thw)


def _stats_kernel(x_ref, g_ref, sx_ref, *, hw, t_hw, n_ti, ragged):
    """Accumulate G = sum_p x x^T and sx = sum_p x over HW tiles (f32 acc on MXU)."""
    ti = pl.program_id(2)

    @pl.when(ti == 0)
    def _():
        g_ref[...] = jnp.zeros_like(g_ref)
        sx_ref[...] = jnp.zeros_like(sx_ref)

    xt = x_ref[0]  # (Cin, t_hw), original input dtype
    if ragged:
        # Last HW tile reads past the array; zero those columns (jnp.where also
        # neutralizes any NaN/Inf garbage coming from stale VMEM).
        t = pl.program_id(1) * n_ti + ti
        col = jax.lax.broadcasted_iota(jnp.int32, xt.shape, 1)
        xt = jnp.where(col < hw - t * t_hw, xt, jnp.zeros_like(xt))

    g = jax.lax.dot_general(
        xt, xt, (((1,), (1,)), ((), ())), preferred_element_type=jnp.float32
    )  # (Cin, Cin)
    g_ref[0] += g
    sx_ref[0] += jnp.sum(xt.astype(jnp.float32), axis=-1, keepdims=True)


def _fused_kernel(x_ref, w_ref, scale_ref, shift_ref, o_ref, *, apply_act):
    """Fused 1x1 conv (matmul) + folded BN affine + optional ReLU."""
    y = jnp.dot(w_ref[...], x_ref[0], preferred_element_type=jnp.float32)  # (Cout, t_hw)
    z = y * scale_ref[...] + shift_ref[...]
    if apply_act:
        z = jnp.maximum(z, 0.0)
    o_ref[0] = z.astype(o_ref.dtype)


def conv_bn_act(x_nchw, weight_oihw, gamma, beta, *, eps=1e-5, apply_act=True):
    """Forward pass of ConvBnAct (training-mode BatchNorm uses batch statistics)."""
    N, Cin, H, W = x_nchw.shape
    Cout = weight_oihw.shape[0]
    assert weight_oihw.shape == (Cout, Cin, 1, 1), "only the 1x1 conv default path"

    HW = H * W
    x = x_nchw.reshape(N, Cin, HW)  # pure view: no dtype / layout copy in HBM
    out_dtype = x.dtype
    w32 = weight_oihw.reshape(Cout, Cin).astype(jnp.float32)
    # Run the MXU at native rate for low-precision inputs; keep f32 weights for f32 x.
    w_mm = w32 if x.dtype == jnp.float32 else w32.astype(x.dtype)

    budget, vmem_limit = _vmem_budget()
    t_hw = _pick_thw(HW, Cin, Cout, x.dtype.itemsize, jnp.dtype(out_dtype).itemsize, budget)
    T = pl.cdiv(HW, t_hw)
    ragged = (HW % t_hw) != 0

    # Split the HW-tile reduction into a parallel outer axis so both v7x
    # TensorCores get work in the stats pass even when N == 1.
    To = 2 if (N == 1 and T >= 2 and T % 2 == 0) else 1
    Ti = T // To

    # ---- pass 1: Gram-matrix batch statistics (y never touches HBM) ----
    g_parts, sx_parts = pl.pallas_call(
        functools.partial(_stats_kernel, hw=HW, t_hw=t_hw, n_ti=Ti, ragged=ragged),
        out_shape=(
            jax.ShapeDtypeStruct((N * To, Cin, Cin), jnp.float32),
            jax.ShapeDtypeStruct((N * To, Cin, 1), jnp.float32),
        ),
        grid_spec=pltpu.PrefetchScalarGridSpec(
            num_scalar_prefetch=0,
            grid=(N, To, Ti),
            in_specs=[
                pl.BlockSpec((1, Cin, t_hw), lambda n, to, ti: (n, 0, to * Ti + ti)),
            ],
            out_specs=[
                pl.BlockSpec((1, Cin, Cin), lambda n, to, ti: (n * To + to, 0, 0)),
                pl.BlockSpec((1, Cin, 1), lambda n, to, ti: (n * To + to, 0, 0)),
            ],
        ),
        compiler_params=pltpu.CompilerParams(
            dimension_semantics=("parallel", "parallel", "arbitrary"),
            vmem_limit_bytes=vmem_limit,
        ),
    )(x)

    # ---- tiny glue: recover per-channel conv-output stats and fold BN affine ----
    M = N * HW
    G = jnp.sum(g_parts, axis=0)                # (Cin, Cin)
    sx = jnp.sum(sx_parts, axis=0)[:, 0]        # (Cin,)
    sum_y = w32 @ sx                            # (Cout,)
    sumsq_y = jnp.sum((w32 @ G) * w32, axis=1)  # (Cout,)
    mean = sum_y / M
    var = jnp.maximum(sumsq_y / M - mean * mean, 0.0)  # guard cancellation
    scale = gamma.astype(jnp.float32) * jax.lax.rsqrt(var + eps)
    shift = beta.astype(jnp.float32) - mean * scale

    # ---- pass 2: fused conv-matmul + BN affine + ReLU, lane-dense NCHW output ----
    # Ragged last HW tile: each y column depends only on its own x column, so
    # garbage read past HW lands in columns whose stores are dropped — no mask needed.
    out = pl.pallas_call(
        functools.partial(_fused_kernel, apply_act=apply_act),
        out_shape=jax.ShapeDtypeStruct((N, Cout, HW), out_dtype),
        grid_spec=pltpu.PrefetchScalarGridSpec(
            num_scalar_prefetch=0,
            grid=(N, T),
            in_specs=[
                pl.BlockSpec((1, Cin, t_hw), lambda n, t: (n, 0, t)),
                pl.BlockSpec((Cout, Cin), lambda n, t: (0, 0)),
                pl.BlockSpec((Cout, 1), lambda n, t: (0, 0)),
                pl.BlockSpec((Cout, 1), lambda n, t: (0, 0)),
            ],
            out_specs=pl.BlockSpec((1, Cout, t_hw), lambda n, t: (n, 0, t)),
        ),
        compiler_params=pltpu.CompilerParams(
            dimension_semantics=("parallel", "parallel"),
            vmem_limit_bytes=vmem_limit,
        ),
    )(x, w_mm, scale.reshape(Cout, 1), shift.reshape(Cout, 1))

    return out.reshape(N, Cout, H, W)  # already NCHW, no slicing


def _reference(x_nchw, weight_oihw, gamma, beta, eps=1e-5, apply_act=True):
    Cout, Cin = weight_oihw.shape[0], weight_oihw.shape[1]
    w = weight_oihw.reshape(Cout, Cin)
    y = jnp.einsum("nchw,oc->nohw", x_nchw, w)
    mean = y.mean(axis=(0, 2, 3))
    var = y.var(axis=(0, 2, 3))  # biased, matches BN training normalization
    yn = (y - mean[None, :, None, None]) / jnp.sqrt(var + eps)[None, :, None, None]
    z = yn * gamma[None, :, None, None] + beta[None, :, None, None]
    if apply_act:
        z = jnp.maximum(z, 0.0)
    return z


if __name__ == "__main__":
    # small, deterministic setup: ConvBnAct(in_channels=4, out_channels=8)
    N, Cin, H, W = 2, 4, 16, 16
    Cout = 8

    key = jax.random.PRNGKey(0)
    kx, kw, kg, kb = jax.random.split(key, 4)

    x = jax.random.normal(kx, (N, Cin, H, W), dtype=jnp.float32)
    weight = jax.random.normal(kw, (Cout, Cin, 1, 1), dtype=jnp.float32) * 0.5
    gamma = 1.0 + 0.1 * jax.random.normal(kg, (Cout,), dtype=jnp.float32)
    beta = 0.1 * jax.random.normal(kb, (Cout,), dtype=jnp.float32)

    out = conv_bn_act(x, weight, gamma, beta, apply_act=True)
    out = jax.block_until_ready(out)

    ref = _reference(x, weight, gamma, beta, apply_act=True)
    assert out.shape == (N, Cout, H, W)
    assert jnp.allclose(out, ref, atol=1e-4, rtol=1e-4), (
        f"max abs err = {jnp.max(jnp.abs(out - ref))}"
    )

    print("KERNEL_OK")
</pallas_src>

<mosaic_0001>
module attributes {stable_mosaic.version = 11 : i64} {
  func.func @_stats_kernel(%arg0: i32, %arg1: i32, %arg2: i32, %arg3: memref<1x4x256xf32, #tpu.memory_space<vmem>>, %arg4: memref<1x4x4xf32, #tpu.memory_space<vmem>>, %arg5: memref<1x4x1xf32, #tpu.memory_space<vmem>>) attributes {dimension_semantics = [#tpu.dimension_semantics<parallel>, #tpu.dimension_semantics<parallel>, #tpu.dimension_semantics<arbitrary>], iteration_bounds = array<i64: 2, 1, 1>, scalar_prefetch = 0 : i64, scratch_operands = 0 : i64, tpu.core_type = #tpu.core_type<tc>, window_params = [{transform_indices = @transform_0, window_bounds = array<i64: 1, 4, 256>}, {transform_indices = @transform_1, window_bounds = array<i64: 1, 4, 4>}, {transform_indices = @transform_2, window_bounds = array<i64: 1, 4, 1>}]} {
    %c0_i32 = arith.constant 0 : i32
    %0 = arith.cmpi eq, %arg2, %c0_i32 : i32
    %1 = arith.extui %0 : i1 to i32
    %c0_i32_0 = arith.constant 0 : i32
    %2 = arith.cmpi ne, %1, %c0_i32_0 : i32
    scf.if %2 {
      %cst_16 = arith.constant 0.000000e+00 : f32
      %20 = vector.broadcast %cst_16 : f32 to vector<1x4x4xf32>
      %c0_17 = arith.constant 0 : index
      %c0_18 = arith.constant 0 : index
      %c0_19 = arith.constant 0 : index
      %21 = vector.load %arg4[%c0_17, %c0_18, %c0_19] : memref<1x4x4xf32, #tpu.memory_space<vmem>>, vector<1x4x4xf32>
      tpu.vector_store %arg4[%c0_17, %c0_18, %c0_19], %20 {strides = array<i32>} : memref<1x4x4xf32, #tpu.memory_space<vmem>>, vector<1x4x4xf32>,
      %cst_20 = arith.constant 0.000000e+00 : f32
      %22 = vector.broadcast %cst_20 : f32 to vector<1x4x1xf32>
      %c0_21 = arith.constant 0 : index
      %c0_22 = arith.constant 0 : index
      %c0_23 = arith.constant 0 : index
      %23 = vector.load %arg5[%c0_21, %c0_22, %c0_23] : memref<1x4x1xf32, #tpu.memory_space<vmem>>, vector<1x4x1xf32>
      tpu.vector_store %arg5[%c0_21, %c0_22, %c0_23], %22 {strides = array<i32>} : memref<1x4x1xf32, #tpu.memory_space<vmem>>, vector<1x4x1xf32>,
    } else {
    }
    %c0 = arith.constant 0 : index
    %c0_1 = arith.constant 0 : index
    %c0_2 = arith.constant 0 : index
    %3 = vector.load %arg3[%c0, %c0_1, %c0_2] : memref<1x4x256xf32, #tpu.memory_space<vmem>>, vector<1x4x256xf32>
    %4 = vector.shape_cast %3 : vector<1x4x256xf32> to vector<4x256xf32>
    %cst = arith.constant dense<0.000000e+00> : vector<4x4xf32>
    %5 = tpu.matmul %4, %4, %cst {dimension_numbers = #tpu.dot_dimension_numbers<[1], [1], [0], [0], [0, 0, 1, 0], [], []>} : vector<4x256xf32>, vector<4x256xf32>, vector<4x4xf32> -> vector<4x4xf32>
    %c0_3 = arith.constant 0 : index
    %c0_4 = arith.constant 0 : index
    %c0_5 = arith.constant 0 : index
    %6 = vector.load %arg4[%c0_3, %c0_4, %c0_5] : memref<1x4x4xf32, #tpu.memory_space<vmem>>, vector<1x4x4xf32>
    %7 = vector.shape_cast %6 : vector<1x4x4xf32> to vector<4x4xf32>
    %8 = arith.addf %7, %5 : vector<4x4xf32>
    %c0_6 = arith.constant 0 : index
    %c0_7 = arith.constant 0 : index
    %c0_8 = arith.constant 0 : index
    %9 = vector.load %arg4[%c0_6, %c0_7, %c0_8] : memref<1x4x4xf32, #tpu.memory_space<vmem>>, vector<1x4x4xf32>
    %10 = vector.shape_cast %9 : vector<1x4x4xf32> to vector<4x4xf32>
    %11 = vector.shape_cast %8 : vector<4x4xf32> to vector<1x4x4xf32>
    tpu.vector_store %arg4[%c0_6, %c0_7, %c0_8], %11 {strides = array<i32>} : memref<1x4x4xf32, #tpu.memory_space<vmem>>, vector<1x4x4xf32>,
    %c0_9 = arith.constant 0 : index
    %c0_10 = arith.constant 0 : index
    %c0_11 = arith.constant 0 : index
    %12 = vector.load %arg5[%c0_9, %c0_10, %c0_11] : memref<1x4x1xf32, #tpu.memory_space<vmem>>, vector<1x4x1xf32>
    %13 = vector.shape_cast %12 : vector<1x4x1xf32> to vector<4x1xf32>
    %cst_12 = arith.constant dense<0.000000e+00> : vector<4xf32>
    %14 = vector.multi_reduction <add>, %4, %cst_12 [1] : vector<4x256xf32> to vector<4xf32>
    %15 = vector.shape_cast %14 : vector<4xf32> to vector<4x1xf32>
    %16 = arith.addf %13, %15 : vector<4x1xf32>
    %c0_13 = arith.constant 0 : index
    %c0_14 = arith.constant 0 : index
    %c0_15 = arith.constant 0 : index
    %17 = vector.load %arg5[%c0_13, %c0_14, %c0_15] : memref<1x4x1xf32, #tpu.memory_space<vmem>>, vector<1x4x1xf32>
    %18 = vector.shape_cast %17 : vector<1x4x1xf32> to vector<4x1xf32>
    %19 = vector.shape_cast %16 : vector<4x1xf32> to vector<1x4x1xf32>
    tpu.vector_store %arg5[%c0_13, %c0_14, %c0_15], %19 {strides = array<i32>} : memref<1x4x1xf32, #tpu.memory_space<vmem>>, vector<1x4x1xf32>,
    return
  }
  func.func @transform_0(%arg0: i32, %arg1: i32, %arg2: i32) -> (i32, i32, i32) {
    %c1_i32 = arith.constant 1 : i32
    %0 = arith.muli %arg1, %c1_i32 : i32
    %1 = arith.addi %0, %arg2 : i32
    %c0_i32 = arith.constant 0 : i32
    %c0_i32_0 = arith.constant 0 : i32
    return %arg0, %c0_i32, %1 : i32, i32, i32
  }
  func.func @transform_1(%arg0: i32, %arg1: i32, %arg2: i32) -> (i32, i32, i32) {
    %c1_i32 = arith.constant 1 : i32
    %0 = arith.muli %arg0, %c1_i32 : i32
    %1 = arith.addi %0, %arg1 : i32
    %c0_i32 = arith.constant 0 : i32
    %c0_i32_0 = arith.constant 0 : i32
    %c0_i32_1 = arith.constant 0 : i32
    return %1, %c0_i32, %c0_i32_0 : i32, i32, i32
  }
  func.func @transform_2(%arg0: i32, %arg1: i32, %arg2: i32) -> (i32, i32, i32) {
    %c1_i32 = arith.constant 1 : i32
    %0 = arith.muli %arg0, %c1_i32 : i32
    %1 = arith.addi %0, %arg1 : i32
    %c0_i32 = arith.constant 0 : i32
    %c0_i32_0 = arith.constant 0 : i32
    %c0_i32_1 = arith.constant 0 : i32
    return %1, %c0_i32, %c0_i32_0 : i32, i32, i32
  }
}

</mosaic_0001>

<bundles_post_ra>
// kernel: tpu_custom_call.1
= control target key start
LH: loop header
LB: loop body
LE: loop exit
PB: predicated region body
PF: predicated region fallthrough
CT: control target
= control target key end

     0   :  { %8 = vsyncpa [#allocation3], 0  ;;  %s836_s0 = inlined_call_operand.hbm [shape: f32[2,4,256], index: 0, kind: input, shape index: {}]   ;;  %s837_s1 = inlined_call_operand.hbm [shape: f32[2,4,4], index: 1, kind: output, shape index: {0}]   ;;  %s838_s2 = inlined_call_operand.vmem [shape: f32[2,4,1], index: 2, kind: output, shape index: {1}]  }
   0x1   :  { %10 = vsyncpa [#allocation3 + $0x1], 0 }
   0x2   :  { %11 = vsyncpa [#allocation4], 0 }
   0x3   :  { %13 = vsyncpa [#allocation4 + $0x1], 0  ;;  %s650_s9 = smov 0   ;;  %s652_s10 = smov 0  }
   0x4   :  { %s654_s11 = smov 0   ;;  %s656_s12 = smov 0  }
   0x5   :  { %s658_s13 = smov 0   ;;  %s660_s14 = smov 0  }
   0x6 LB: > { %s438_s15 = sadd.s32 4294967295, %s630_s14   ;;  %s439_s16 = sadd.s32 4294967294, %s630_s14   ;;  %s630_s14 = sphi %s660_s14, %s19_s14   ;;  %s626_s13 = sphi %s658_s13, %s854_s13   ;;  %s622_s12 = sphi %s656_s12, %s853_s12   ;;  %s618_s11 = sphi %s654_s11, %s852_s11   ;;  %s614_s10 = sphi %s652_s10, %s851_s10   ;;  %s610_s9 = sphi %s650_s9, %s850_s9  }
   0x7   : > { %s38_s17 = sadd.s32 1, %s626_s13  ;;  %s49_s18 = sadd.s32 1, %s618_s11 }
   0x8   : > { %p40_p0 = scmp.ge.s32.totalorder %s38_s17, 2  ;;  %p56_p1 = scmp.ne.s32.totalorder %s618_s11, %s614_s10 }
   0x9   : > { %p57_p2 = scmp.eq.s32.totalorder %s630_s14, 0  ;;  %p62_p3 = scmp.ne.s32.totalorder %s614_s10, %s610_s9 }
   0xa   : > { %s856_s17 = smov (%p40_p0, %s38_s17), 0  ;;  %p63_p5 = scmp.eq.s32.totalorder %s438_s15, 0 }
   0xb   : > { %p691_p4 = por %p57_p2, %p56_p1  ;;  %s44_s20 = ssub.s32 %s626_s13, %s856_s17 }
   0xc   : > { %p88_p6 = scmp.eq.s32.totalorder %s438_s15, 1  ;;  %p47_p7 = scmp.eq.s32.totalorder %s44_s20, 0 }
   0xd   : > { %p697_p8 = por %p63_p5, %p62_p3  ;;  %p94_p10 = scmp.eq.s32.totalorder %s439_s16, 1 }
   0xe   : > { %p701_p9 = por %p88_p6, %p56_p1  ;;  %p466_p13 = scmp.lt.s32.totalorder %s630_s14, 2 }
   0xf   : > { %s706_s23 = scalar_select %p47_p7, %s618_s11, %s49_s18  }
  0x10   : > { %s842_s22 = scalar_select %p701_p9, 1, 0 }
  0x11   : > { %p708_p11 = por %p94_p10, %p62_p3  ;;  %s142_s25 = sand.u32 1, %s618_s11  }
  0x12   : > { %s442_s26 = sshll.u32 %s142_s25, 3  ;;  %s453_s27 = sshll.u32 %s626_s13, 7 }
  0x13   : > { %s843_s24 = scalar_select %p708_p11, 1, 0 }
  0x14   : > { %s719_s30 = scalar_lea.hbm %s836_s0, %s453_s27  ;;  %s146_s3 = scalar_lea.vmem [#allocation2], %s442_s26 }
  0x15   : > { %s157_s4 = sshll.u32 %s146_s3, 4  ;;  %p725_p0 = pnand %p466_p13, %p691_p4  ;;  %s721_s4 = int_to_ptr.vmem [resolvable:$true] %s157_s4 }
  0x16   : > { %s143_s6 = scalar_lea.sflag [#allocation3], %s142_s25  ;;  %s518_s7 = scalar_lea.hbm %s719_s30, 128 }
  0x17   : > { %p519_p3 = scmp.ne.s32.totalorder %s719_s30, %s518_s7  ;;  %p520_p5 = pneg %p725_p0 }
  0x18   : > { %s523_s16 = scalar_lea.hbm %s836_s0, 256  ;;  %p524_p4 = scmp.lt.u32.totalorder %s719_s30, %s836_s0 }
  0x19   : > { %p521_p6 = pnand %p520_p5, %p519_p3  ;;  %p525_p10 = scmp.lt.u32.totalorder %s523_s16, %s518_s7 }
  0x1a   : > { %p527_p12 = scmp.lt.u32.totalorder %s518_s7, %s719_s30 }
  0x1b   : > { %p522_p7 = pneg %p521_p6  ;;  %p526_p13 = por %p525_p10, %p524_p4 }
  0x1d   : > { %p528_p1 = por %p527_p12, %p526_p13 }
  0x1f   : > { %p529_p2 = pnand %p528_p1, %p522_p7 }
  0x21   : > { %532 = shalt.err (!%p529_p2)
}
  0x22   : > { %s533_s20 = scalar_lea.vmem %s721_s4, 128  ;;  %s632_s25 = smov [#allocation2]  }
  0x23   : > { %p534_p3 = scmp.ne.s32.totalorder %s721_s4, %s533_s20  ;;  %s538_s26 = sshll.u32 %s632_s25, 4  ;;  %s539_s26 = int_to_ptr.vmem [resolvable:$false] %s538_s26 }
  0x24   : > { %s540_s27 = scalar_lea.vmem %s539_s26, 256  ;;  %p541_p9 = scmp.lt.s32.totalorder %s721_s4, %s539_s26 }
  0x25   : > { %p536_p6 = pnand %p534_p3, %p520_p5  ;;  %p542_p4 = scmp.lt.s32.totalorder %s540_s27, %s533_s20 }
  0x27   : > { %p537_p11 = pneg %p536_p6  ;;  %p543_p10 = por %p542_p4, %p541_p9 }
  0x29   : > { %p544_p12 = pnand %p543_p10, %p537_p11 }
  0x2b   : > { %547 = shalt.err (!%p544_p12)
}
  0x2c   : > { %461 = dma.hbm_to_vmem [thread:$0]  (!%p725_p0), %s719_s30, 128, %s721_s4, %s143_s6  }
  0x2d   : > { %p845_p1 = scmp.lt.s32.totalorder %s630_s14, 3  ;;  %p846_p2 = scmp.ge.s32.totalorder %s630_s14, 1 }
  0x2f   : > { %p163_p5 = pnand %p846_p2, %p845_p1 }
  0x30   : > { %s761_s28 = sand.u32 (!%p163_p5), 1, %s614_s10  }
  0x31   : > { %166 = sbr.rel (%p163_p5) target bundleno = 292 (0x124), region = 24  ;;  %s446_s29 = sshll.u32 (!%p163_p5), %s761_s28, 3 }
  0x32   : > { %s169_s3 = scalar_lea.sflag (!%p163_p5), [#allocation3], %s761_s28  ;;  %s172_s7 = scalar_lea.vmem (!%p163_p5), [#allocation2], %s446_s29 }
  0x38   : > { %601 = dma.done.wait (%p697_p8), %s169_s3, 128  }
  0x39   : > { %603 = vsyncadd (%p697_p8), %s169_s3, 4294967168  ;;  %s447_s30 = sshll.u32 %s761_s28, 2  ;;  %vm211_vm0 = vcmask 27648   ;;  %v633_v0 = vmov 0.0   ;;  %vm294_vm1 = vcmask 1043456   ;;  %v215_v1 = vld [vmem:[%s172_s7] sm:$0xff] }
  0x3a   : > { %s770_s4 = scalar_lea.vmem [#allocation5], %s447_s30  ;;  %v217_v2 = vcombine.high %v215_v1, %v215_v1  ;;  %v295_v3 = vsel %vm294_vm1, %v215_v1, 0.0  ;;  %p202_p8 = scmp.lt.s32.totalorder %s622_s12, 1  ;;  %vm213_vm2 = vcmask 3072  }
  0x3b   : > { %212 = vst.msk [vmem:[%s770_s4] sm:$0xf] %vm211_vm0, %v633_v0  ;;  %s450_s16 = sshll.u32 %s622_s12, 6  ;;  %s323_s18 = sshll.u32 %s770_s4, 4  ;;  %s787_s18 = int_to_ptr.vmem [resolvable:$true] %s323_s18 }
  0x3c   : > { %219 = vmatprep.subr.mxu0 %v217_v2  ;;  %283 = vmatprep.mubr.f32.mxu0 %v217_v2  ;;  %v296_v4 = vsel %vm294_vm1, %v217_v2, 0.0  ;;  %s203_s21 = scalar_select %p202_p8, %s622_s12, 1 }
  0x3d   : > { %220 = vmatpush1.xpose.msra.mxu0 %v215_v1  ;;  %v297_v5 = vadd.f32 %v296_v4, %v295_v3  ;;  %s785_s25 = scalar_lea.hbm %s837_s1, %s450_s16  ;;  %s304_s26 = scalar_lea.sflag [#allocation4], %s761_s28 }
  0x3e   : > { %s448_s5 = sshll.u32 %s203_s21, 2  ;;  %s548_s27 = scalar_lea.vmem %s787_s18, 64 }
  0x3f   : > { %298 = vadd.xlane.f32.xlu0 %v297_v5  ;;  %s205_s15 = scalar_lea.vmem %s838_s2, %s448_s5  ;;  %p549_p9 = scmp.ne.s32.totalorder %s787_s18, %s548_s27 }
  0x40   : > { %284 = vmatmul.mubr.f32.vlgmr.msra.gmra.mrb[0].mxu0 %v215_v1  ;;  %214 = vst.msk [vmem:[%s205_s15] sm:$0xf] %vm213_vm2, %v633_v0  ;;  %p847_p11 = scmp.ne.s32.totalorder %s842_s22, 0  ;;  %s634_s12 = smov [#allocation5]  }
  0x41   : > { %s552_s29 = sshll.u32 %s634_s12, 4  ;;  %s553_s29 = int_to_ptr.vmem [resolvable:$false] %s552_s29 }
  0x42   : > { %v289_v9 = vld [vmem:[%s770_s4] sm:$0xf]  ;;  %p550_p0 = pnand %p549_p9, %p847_p11  ;;  %s554_s3 = scalar_lea.vmem %s553_s29, 128 }
  0x43   : > { %p555_p13 = scmp.lt.s32.totalorder %s787_s18, %s553_s29  ;;  %p556_p3 = scmp.lt.s32.totalorder %s554_s3, %s548_s27 }
  0x44   : > { %p551_p7 = pneg %p550_p0 }
  0x45   : > { %p557_p6 = por %p556_p3, %p555_p13 }
  0x47   : > { %v293_v6 = vld [vmem:[%s205_s15] sm:$0xf]  ;;  %p558_p4 = pnand %p557_p6, %p551_p7 }
  0xcc   : > { %v299_v7 = vpop.xlane.xlu0 %298 }
  0xcd   : > { %v300_v8 = vadd.f32 %v299_v7, %v293_v6 }
  0xcf   : > { %302 = vst.msk [vmem:[%s205_s15] sm:$0xf] %vm213_vm2, %v300_v8 }
 0x113   : > { %v285_v10 = vpop.f32.mrb[0].mxu0 }
 0x114   : > { %v290_v11 = vadd.f32 %v289_v9, %v285_v10  ;;  %v287_v12 = vpop.f32.mrb[1].mxu0 }
 0x116   : > { %292 = vst.msk [vmem:[%s770_s4] sm:$0xf] %vm211_vm0, %v290_v11 }
 0x117   : > { %561 = shalt.err (!%p558_p4)
}
 0x118   : > { %s562_s28 = scalar_lea.hbm %s785_s25, 64  ;;  %s566_s4 = scalar_lea.hbm %s837_s1, 128 }
 0x119   : > { %p563_p10 = scmp.ne.s32.totalorder %s785_s25, %s562_s28  ;;  %p567_p2 = scmp.lt.u32.totalorder %s785_s25, %s837_s1 }
 0x11a   : > { %p568_p5 = scmp.lt.u32.totalorder %s566_s4, %s562_s28  ;;  %p570_p9 = scmp.lt.u32.totalorder %s562_s28, %s785_s25 }
 0x11b   : > { %p564_p12 = pnand %p563_p10, %p847_p11 }
 0x11c   : > { %p569_p8 = por %p568_p5, %p567_p2 }
 0x11d   : > { %p565_p1 = pneg %p564_p12 }
 0x11e   : > { %p571_p0 = por %p570_p9, %p569_p8 }
 0x120   : > { %p572_p7 = pnand %p571_p0, %p565_p1 }
 0x122   : > { %575 = shalt.err (!%p572_p7)
}
 0x123   : > { %456 = dma.vmem_to_hbm [thread:$0]  (%p847_p11), %s787_s18, 64, %s785_s25, %s304_s26  }
 0x124 PF: > { %s339_s6 = sand.u32 1, %s610_s9   ;;  %p848_p13 = scmp.ne.s32.totalorder %s843_s24, 0 }
 0x125   : > { %p849_p3 = scmp.ge.s32.totalorder %s630_s14, 2  ;;  %s340_s8 = scalar_lea.sflag [#allocation4], %s339_s6 }
 0x127   : > { %p463_p6 = pnand %p849_p3, %p848_p13 }
 0x129   : > { %605 = dma.done.wait (!%p463_p6), %s340_s8, 64  }
 0x12a   : > { %607 = vsyncadd (!%p463_p6), %s340_s8, 4294967232  ;;  %s19_s14 = sadd.s32 1, %s630_s14   ;;  %s850_s9 = smov %s614_s10 }
 0x12b   : > { %p16_p4 = scmp.ge.s32.totalorder %s19_s14, 4   ;;  %s851_s10 = smov %s618_s11 }
 0x12c   : > { %s852_s11 = smov %s706_s23  ;;  %s853_s12 = smov %s626_s13 }
 0x12d   : > { %s854_s13 = smov %s856_s17  ;;  %18 = sbr.rel (!%p16_p4) target bundleno = 6 (0x6), region = 85 }
 0x134   :  { %353 = vsyncpa [#allocation3], 1 }
 0x135   :  { %355 = vsyncpa [#allocation3 + $0x1], 1 }
 0x136   :  { %356 = vsyncpa [#allocation4], 1 }
 0x137   :  { %358 = vsyncpa [#allocation4 + $0x1], 1 }

</bundles_post_ra>
